<compile_context>
chip_gen: v7x
topology: tpu7x:2x2x1
jax: 0.10.0
libtpu: 0.0.40
codegen_flags: <defaults>
</compile_context>

<pallas_src>
import functools
import math

import jax
import jax.numpy as jnp
from jax.experimental import pallas as pl
from jax.experimental.pallas import tpu as pltpu

# 48 MiB: comfortably below v7x's 64 MiB physical VMEM, leaves headroom on
# v5e/v6e (128 MiB) for bigger tiles if _pick_tile grows them.
VMEM_LIMIT = 48 * 1024 * 1024


def _pick_tile(dim, target, align):
    """Largest tile <= target that is a multiple of `align` and divides `dim`.
    Falls back to the full dim (a full-extent block is always layout-legal).
    TODO(synk): for awkward huge dims (e.g. vocab not divisible by 128) the
    fallback keeps the whole dim resident; guard at production sizes."""
    if dim <= target:
        return dim
    t = (target // align) * align
    while t >= align:
        if dim % t == 0:
            return t
        t -= align
    return dim


# ---------------------------------------------------------------------------
# Pallas kernels
# ---------------------------------------------------------------------------
def linear_kernel(x_ref, w_ref, b_ref, o_ref, acc_ref, *, activation):
    """o = act(x @ w + b), tiled over (M, N, K); bf16 inputs, f32 accumulation."""
    k = pl.program_id(2)

    @pl.when(k == 0)
    def _():
        acc_ref[...] = jnp.zeros_like(acc_ref)

    acc_ref[...] += jnp.dot(x_ref[...], w_ref[...],
                            preferred_element_type=jnp.float32)

    @pl.when(k == pl.num_programs(2) - 1)
    def _():
        y = acc_ref[...] + b_ref[...]
        if activation == "silu":
            y = y * jax.nn.sigmoid(y)
        o_ref[...] = y.astype(o_ref.dtype)


def qkv_kernel(x_ref, w_ref, b_ref, q_ref, k_ref, v_ref, acc_ref, *, hidden):
    """Fused QKV projection: one weight stream over x, three separate outputs
    (no wrapper-side slices).  Grid = (M tiles, K tiles)."""
    kk = pl.program_id(1)

    @pl.when(kk == 0)
    def _():
        acc_ref[...] = jnp.zeros_like(acc_ref)

    acc_ref[...] += jnp.dot(x_ref[...], w_ref[...],
                            preferred_element_type=jnp.float32)

    @pl.when(kk == pl.num_programs(1) - 1)
    def _():
        y = acc_ref[...] + b_ref[...]
        q_ref[...] = y[:, :hidden].astype(q_ref.dtype)
        k_ref[...] = y[:, hidden:2 * hidden].astype(k_ref.dtype)
        v_ref[...] = y[:, 2 * hidden:].astype(v_ref.dtype)


def attention_kernel(q_ref, k_ref, v_ref, pk_ref, pv_ref, o_ref,
                     *, num_heads, head_dim, scale):
    """One batch element, all heads per grid step.  Softmax merges the
    [cache + current] keys with the persistent-memory keys (no concatenation).
    q/k/v stay in the flat [T, H] layout; the per-head split happens in VMEM."""
    nh, hd = num_heads, head_dim
    T = q_ref.shape[1]
    S = k_ref.shape[1]

    # fold the softmax scale into q once (O(T*hd) VPU work, not O(T*S))
    q = (q_ref[0] * scale).reshape(T, nh, hd).transpose(1, 0, 2)   # (nh, T, hd)
    k = k_ref[0].reshape(S, nh, hd).transpose(1, 0, 2)             # (nh, S, hd)
    v = v_ref[0].reshape(S, nh, hd).transpose(1, 0, 2)             # (nh, S, hd)
    pk = pk_ref[...]                                               # (nh, P, hd)
    pv = pv_ref[...]                                               # (nh, P, hd)

    s_c = jnp.einsum("ntd,nsd->nts", q, k, preferred_element_type=jnp.float32)
    s_p = jnp.einsum("ntd,npd->ntp", q, pk, preferred_element_type=jnp.float32)

    m = jnp.maximum(jnp.max(s_c, axis=-1, keepdims=True),
                    jnp.max(s_p, axis=-1, keepdims=True))          # (nh, T, 1)
    e_c = jnp.exp(s_c - m)
    e_p = jnp.exp(s_p - m)
    denom = (jnp.sum(e_c, axis=-1, keepdims=True)
             + jnp.sum(e_p, axis=-1, keepdims=True))

    o = (jnp.einsum("nts,nsd->ntd", e_c.astype(jnp.bfloat16), v,
                    preferred_element_type=jnp.float32)
         + jnp.einsum("ntp,npd->ntd", e_p.astype(jnp.bfloat16), pv,
                      preferred_element_type=jnp.float32))
    o = o * pl.reciprocal(denom, approx=True)                      # EUP divide
    o_ref[0] = o.transpose(1, 0, 2).reshape(T, nh * hd).astype(o_ref.dtype)


def mem_mlp_kernel(k_ref, q_ref, v_ref, w_ref, b_ref, out_ref, loss_ref,
                   *, num_layers):
    """Neural-memory MLP: the key pass (associative MSE "surprise" loss) and the
    query pass (retrieval) run as ONE matmul per layer by stacking rows.  Loss
    partials are per-row-block outputs, so the grid axis stays 'parallel'."""
    tm = k_ref.shape[0]
    z = jnp.concatenate([k_ref[...], q_ref[...]], axis=0)   # (2*tm, H) bf16

    zf = None
    for li in range(num_layers):
        zf = jnp.dot(z, w_ref[li], preferred_element_type=jnp.float32) + b_ref[li]
        if li < num_layers - 1:
            zf = zf * jax.nn.sigmoid(zf)
        z = zf.astype(jnp.bfloat16)

    zk = zf[:tm]                                  # key -> value reconstruction
    zq = zf[tm:]                                  # retrieval with queries
    out_ref[...] = zq.astype(out_ref.dtype)

    d = zk - v_ref[...].astype(jnp.float32)
    loss_ref[...] = jnp.sum(d * d, axis=0, keepdims=True)   # (1, H) partials


def block_tail_kernel(x_ref, attn_ref, mem_ref, w1_ref, b1_ref, w2_ref, b2_ref,
                      o_ref):
    """h1 = x + attn + mem ; out = h1 + W2(silu(W1 h1 + b1)) + b2, fused."""
    h1_f32 = (x_ref[...].astype(jnp.float32)
              + attn_ref[...].astype(jnp.float32)
              + mem_ref[...].astype(jnp.float32))
    h1 = h1_f32.astype(jnp.bfloat16)
    h = jnp.dot(h1, w1_ref[...], preferred_element_type=jnp.float32) + b1_ref[...]
    h = h * jax.nn.sigmoid(h)
    y = jnp.dot(h.astype(jnp.bfloat16), w2_ref[...],
                preferred_element_type=jnp.float32) + b2_ref[...]
    o_ref[...] = (h1_f32 + y).astype(o_ref.dtype)


# ---------------------------------------------------------------------------
# Pallas wrappers
# ---------------------------------------------------------------------------
def linear(x, w, b, activation=None, out_dtype=jnp.bfloat16):
    M, K = x.shape
    N = w.shape[1]
    tm = _pick_tile(M, 256, 16)     # 16: bf16 sublane packing
    tn = _pick_tile(N, 512, 128)
    tk = _pick_tile(K, 512, 128)
    return pl.pallas_call(
        functools.partial(linear_kernel, activation=activation),
        out_shape=jax.ShapeDtypeStruct((M, N), out_dtype),
        grid=(M // tm, N // tn, K // tk),
        in_specs=[
            pl.BlockSpec((tm, tk), lambda i, j, k: (i, k)),
            pl.BlockSpec((tk, tn), lambda i, j, k: (k, j)),
            pl.BlockSpec((1, tn), lambda i, j, k: (0, j)),
        ],
        out_specs=pl.BlockSpec((tm, tn), lambda i, j, k: (i, j)),
        scratch_shapes=[pltpu.VMEM((tm, tn), jnp.float32)],
        compiler_params=pltpu.CompilerParams(
            dimension_semantics=("parallel", "parallel", "arbitrary"),
            vmem_limit_bytes=VMEM_LIMIT),
    )(x, w, b)


def qkv_proj(x, w_qkv, b_qkv):
    """x: [M, H] bf16, w_qkv: [H, 3H] bf16 -> (q, k, v) each [M, H] bf16."""
    M, K = x.shape
    H3 = w_qkv.shape[1]
    H = H3 // 3
    tm = _pick_tile(M, 256, 16)
    tk = _pick_tile(K, 512, 128)
    # TODO(synk): for very large H the 3H output width would need N tiling too.
    return pl.pallas_call(
        functools.partial(qkv_kernel, hidden=H),
        out_shape=(jax.ShapeDtypeStruct((M, H), jnp.bfloat16),) * 3,
        grid=(M // tm, K // tk),
        in_specs=[
            pl.BlockSpec((tm, tk), lambda i, kk: (i, kk)),
            pl.BlockSpec((tk, H3), lambda i, kk: (kk, 0)),
            pl.BlockSpec((1, H3), lambda i, kk: (0, 0)),
        ],
        out_specs=tuple(pl.BlockSpec((tm, H), lambda i, kk: (i, 0))
                        for _ in range(3)),
        scratch_shapes=[pltpu.VMEM((tm, H3), jnp.float32)],
        compiler_params=pltpu.CompilerParams(
            dimension_semantics=("parallel", "arbitrary"),
            vmem_limit_bytes=VMEM_LIMIT),
    )(x, w_qkv, b_qkv)


def attention(q, k, v, pm_k, pm_v, scale, num_heads, head_dim):
    """q: [B, T, H], k/v: [B, S, H], pm_k/pm_v: [nh, P, hd] -> [B, T, H] bf16."""
    B, T, H = q.shape
    S = k.shape[1]
    P = pm_k.shape[1]
    # TODO(synk): for long sequences this should additionally tile T/S
    # (flash-style online softmax); at these shapes one batch fits per step.
    return pl.pallas_call(
        functools.partial(attention_kernel, num_heads=num_heads,
                          head_dim=head_dim, scale=scale),
        out_shape=jax.ShapeDtypeStruct((B, T, H), jnp.bfloat16),
        grid=(B,),
        in_specs=[
            pl.BlockSpec((1, T, H), lambda b: (b, 0, 0)),
            pl.BlockSpec((1, S, H), lambda b: (b, 0, 0)),
            pl.BlockSpec((1, S, H), lambda b: (b, 0, 0)),
            # constant block index -> persistent memory is DMA'd once
            pl.BlockSpec((num_heads, P, head_dim), lambda b: (0, 0, 0)),
            pl.BlockSpec((num_heads, P, head_dim), lambda b: (0, 0, 0)),
        ],
        out_specs=pl.BlockSpec((1, T, H), lambda b: (b, 0, 0)),
        compiler_params=pltpu.CompilerParams(
            dimension_semantics=("parallel",),
            vmem_limit_bytes=VMEM_LIMIT),
    )(q, k, v, pm_k, pm_v)


def mem_mlp(kf, qf, vf, w_stack, b_stack):
    M, H = kf.shape
    L = w_stack.shape[0]
    tm = _pick_tile(M, 256, 16)
    n_blk = M // tm
    mem_out, loss_parts = pl.pallas_call(
        functools.partial(mem_mlp_kernel, num_layers=L),
        out_shape=(jax.ShapeDtypeStruct((M, H), jnp.bfloat16),
                   jax.ShapeDtypeStruct((n_blk, H), jnp.float32)),
        grid=(n_blk,),
        in_specs=[
            pl.BlockSpec((tm, H), lambda i: (i, 0)),
            pl.BlockSpec((tm, H), lambda i: (i, 0)),
            pl.BlockSpec((tm, H), lambda i: (i, 0)),
            pl.BlockSpec((L, H, H), lambda i: (0, 0, 0)),
            pl.BlockSpec((L, 1, H), lambda i: (0, 0, 0)),
        ],
        out_specs=(
            pl.BlockSpec((tm, H), lambda i: (i, 0)),
            pl.BlockSpec((1, H), lambda i: (i, 0)),   # per-block partials
        ),
        compiler_params=pltpu.CompilerParams(
            dimension_semantics=("parallel",),        # safe: no cross-step accum
            vmem_limit_bytes=VMEM_LIMIT),
    )(kf, qf, vf, w_stack, b_stack)
    mem_loss = jnp.sum(loss_parts) / float(M * H)
    return mem_out, mem_loss


def block_tail(xf, attn_out, mem_out, w1, b1, w2, b2):
    M, H = xf.shape
    F = w1.shape[1]
    tm = _pick_tile(M, 256, 16)
    # TODO(synk): for production ff_dim, add K/N tiling of the FFN weights so the
    # resident (H,F)+(F,H) bf16 blocks stay inside v7x's 64 MiB VMEM.
    return pl.pallas_call(
        block_tail_kernel,
        out_shape=jax.ShapeDtypeStruct((M, H), jnp.bfloat16),
        grid=(M // tm,),
        in_specs=[
            pl.BlockSpec((tm, H), lambda i: (i, 0)),
            pl.BlockSpec((tm, H), lambda i: (i, 0)),
            pl.BlockSpec((tm, H), lambda i: (i, 0)),
            pl.BlockSpec((H, F), lambda i: (0, 0)),
            pl.BlockSpec((1, F), lambda i: (0, 0)),
            pl.BlockSpec((F, H), lambda i: (0, 0)),
            pl.BlockSpec((1, H), lambda i: (0, 0)),
        ],
        out_specs=pl.BlockSpec((tm, H), lambda i: (i, 0)),
        compiler_params=pltpu.CompilerParams(
            dimension_semantics=("parallel",),
            vmem_limit_bytes=VMEM_LIMIT),
    )(xf, attn_out, mem_out, w1, b1, w2, b2)


# ---------------------------------------------------------------------------
# Model (glue in plain JAX, hot paths in Pallas)
# ---------------------------------------------------------------------------
def init_params(key, cfg):
    H = cfg["hidden_dim"]
    nh, hd = cfg["num_heads"], cfg["head_dim"]
    ff = cfg["ff_dim"]
    P = cfg["persistent_memory_length"]
    L = cfg["memory_num_layers"]
    V = cfg["vocab_size"]

    def dense(k, shape):
        # weights stored bf16 (MXU inputs); biases stay f32 (added to f32 acc)
        return (jax.random.normal(k, shape, jnp.float32) * 0.02).astype(jnp.bfloat16)

    keys = iter(jax.random.split(key, 256))
    params = {
        "embedding": dense(next(keys), (V, H)),
        "w_final": dense(next(keys), (H, V)),
        "b_final": jnp.zeros((1, V), jnp.float32),
        "blocks": [],
    }
    for _ in range(cfg["num_blocks"]):
        blk = {
            "w_qkv": dense(next(keys), (H, 3 * H)),
            "b_qkv": jnp.zeros((1, 3 * H), jnp.float32),
            "wo": dense(next(keys), (H, H)), "bo": jnp.zeros((1, H), jnp.float32),
            "pm_k": dense(next(keys), (nh, P, hd)),
            "pm_v": dense(next(keys), (nh, P, hd)),
            "mem_w": dense(next(keys), (L, H, H)),
            "mem_b": jnp.zeros((L, 1, H), jnp.float32),
            "w1": dense(next(keys), (H, ff)), "b1": jnp.zeros((1, ff), jnp.float32),
            "w2": dense(next(keys), (ff, H)), "b2": jnp.zeros((1, H), jnp.float32),
        }
        params["blocks"].append(blk)
    return params


def mac_block_forward(x, cache_k, cache_v, p, cfg):
    B, T, H = x.shape
    nh, hd = cfg["num_heads"], cfg["head_dim"]
    M = B * T
    xf = x.reshape(M, H)

    # fused Q/K/V projection -> three separate bf16 [M, H] outputs (no slices)
    qf, kf, vf = qkv_proj(xf, p["w_qkv"], p["b_qkv"])

    # attention cache layout [B, S, nh, hd] is a free contiguous reshape
    k4 = kf.reshape(B, T, nh, hd)
    v4 = vf.reshape(B, T, nh, hd)
    new_k = jnp.concatenate([cache_k, k4], axis=1)
    new_v = jnp.concatenate([cache_v, v4], axis=1)
    S = new_k.shape[1]

    scale = 1.0 / (math.sqrt(hd) * cfg["temperature"])
    attn = attention(qf.reshape(B, T, H),
                     new_k.reshape(B, S, H),
                     new_v.reshape(B, S, H),
                     p["pm_k"], p["pm_v"], scale, nh, hd)          # [B, T, H]
    attn_out = linear(attn.reshape(M, H), p["wo"], p["bo"])

    # neural memory: key pass (surprise loss) + query pass (retrieval), fused
    mem_out, mem_loss = mem_mlp(kf, qf, vf, p["mem_w"], p["mem_b"])

    # residuals + FFN, fused
    out_f = block_tail(xf, attn_out, mem_out, p["w1"], p["b1"], p["w2"], p["b2"])
    return out_f.reshape(B, T, H), new_k, new_v, mem_loss


def mac_forward(tokens, params, cfg, cache_key=None, cache_value=None):
    B, T = tokens.shape
    nh, hd = cfg["num_heads"], cfg["head_dim"]
    H = cfg["hidden_dim"]
    V = cfg["vocab_size"]

    x = params["embedding"][tokens]   # embedding gather (glue), bf16

    if cache_key is None or cache_value is None:
        empty = jnp.zeros((B, 0, nh, hd), jnp.bfloat16)
        cache_key = [empty for _ in params["blocks"]]
        cache_value = [empty for _ in params["blocks"]]

    new_cache_key, new_cache_value, mem_losses = [], [], []
    for p, ck, cv in zip(params["blocks"], cache_key, cache_value):
        x, attn_k, attn_v, mem_loss = mac_block_forward(x, ck, cv, p, cfg)
        new_cache_key.append(attn_k)
        new_cache_value.append(attn_v)
        mem_losses.append(mem_loss)

    logits = linear(x.reshape(B * T, H), params["w_final"],
                    params["b_final"]).reshape(B, T, V)
    return logits, new_cache_key, new_cache_value, mem_losses


# ---------------------------------------------------------------------------
if __name__ == "__main__":
    cfg = dict(
        hidden_dim=32,
        num_heads=4,
        head_dim=8,
        ff_dim=64,
        persistent_memory_length=4,
        memory_num_layers=2,
        num_blocks=2,
        vocab_size=64,
        temperature=1.0,
    )
    key = jax.random.PRNGKey(0)
    pkey, tkey = jax.random.split(key)
    params = init_params(pkey, cfg)

    B, T = 2, 8
    tokens = jax.random.randint(tkey, (B, T), 0, cfg["vocab_size"], dtype=jnp.int32)

    logits, new_ck, new_cv, mem_losses = mac_forward(tokens, params, cfg)
    jax.block_until_ready(logits)
    for t in new_ck + new_cv + mem_losses:
        jax.block_until_ready(t)

    assert logits.shape == (B, T, cfg["vocab_size"])
    assert all(k.shape == (B, T, cfg["num_heads"], cfg["head_dim"]) for k in new_ck)
    assert all(v.shape == (B, T, cfg["num_heads"], cfg["head_dim"]) for v in new_cv)
    assert len(mem_losses) == cfg["num_blocks"]
    assert all(bool(jnp.isfinite(l)) for l in mem_losses)
    assert bool(jnp.all(jnp.isfinite(logits.astype(jnp.float32))))
    print("KERNEL_OK")
</pallas_src>

<mosaic_0001>
module attributes {stable_mosaic.version = 11 : i64} {
  func.func @qkv_kernel(%arg0: i32, %arg1: i32, %arg2: memref<16x32xbf16, #tpu.memory_space<vmem>>, %arg3: memref<32x96xbf16, #tpu.memory_space<vmem>>, %arg4: memref<1x96xf32, #tpu.memory_space<vmem>>, %arg5: memref<16x32xbf16, #tpu.memory_space<vmem>>, %arg6: memref<16x32xbf16, #tpu.memory_space<vmem>>, %arg7: memref<16x32xbf16, #tpu.memory_space<vmem>>, %arg8: memref<16x96xf32, #tpu.memory_space<vmem>>) attributes {dimension_semantics = [#tpu.dimension_semantics<parallel>, #tpu.dimension_semantics<arbitrary>], iteration_bounds = array<i64: 1, 1>, scalar_prefetch = 0 : i64, scratch_operands = 1 : i64, tpu.core_type = #tpu.core_type<tc>, window_params = [{transform_indices = @transform_0, window_bounds = array<i64: 16, 32>}, {transform_indices = @transform_1, window_bounds = array<i64: 32, 96>}, {pipeline_mode = #tpu.pipeline_mode<synchronous>, transform_indices = @transform_2, window_bounds = array<i64: 1, 96>}, {transform_indices = @transform_3, window_bounds = array<i64: 16, 32>}, {transform_indices = @transform_4, window_bounds = array<i64: 16, 32>}, {transform_indices = @transform_5, window_bounds = array<i64: 16, 32>}]} {
    %c0_i32 = arith.constant 0 : i32
    %0 = arith.cmpi eq, %arg1, %c0_i32 : i32
    %1 = arith.extui %0 : i1 to i32
    %c0_i32_0 = arith.constant 0 : i32
    %2 = arith.cmpi ne, %1, %c0_i32_0 : i32
    scf.if %2 {
      %cst_10 = arith.constant 0.000000e+00 : f32
      %12 = vector.broadcast %cst_10 : f32 to vector<16x96xf32>
      %c0_11 = arith.constant 0 : index
      %c0_12 = arith.constant 0 : index
      %13 = vector.load %arg8[%c0_11, %c0_12] : memref<16x96xf32, #tpu.memory_space<vmem>>, vector<16x96xf32>
      tpu.vector_store %arg8[%c0_11, %c0_12], %12 {strides = array<i32>} : memref<16x96xf32, #tpu.memory_space<vmem>>, vector<16x96xf32>,
    } else {
    }
    %c0 = arith.constant 0 : index
    %c0_1 = arith.constant 0 : index
    %3 = vector.load %arg8[%c0, %c0_1] : memref<16x96xf32, #tpu.memory_space<vmem>>, vector<16x96xf32>
    %c0_2 = arith.constant 0 : index
    %c0_3 = arith.constant 0 : index
    %4 = vector.load %arg2[%c0_2, %c0_3] : memref<16x32xbf16, #tpu.memory_space<vmem>>, vector<16x32xbf16>
    %c0_4 = arith.constant 0 : index
    %c0_5 = arith.constant 0 : index
    %5 = vector.load %arg3[%c0_4, %c0_5] : memref<32x96xbf16, #tpu.memory_space<vmem>>, vector<32x96xbf16>
    %cst = arith.constant dense<0.000000e+00> : vector<16x96xf32>
    %6 = tpu.matmul %4, %5, %cst {dimension_numbers = #tpu.dot_dimension_numbers<[1], [0], [0], [1], [0, 0, 1, 1], [], []>} : vector<16x32xbf16>, vector<32x96xbf16>, vector<16x96xf32> -> vector<16x96xf32>
    %7 = arith.addf %3, %6 : vector<16x96xf32>
    %c0_6 = arith.constant 0 : index
    %c0_7 = arith.constant 0 : index
    %8 = vector.load %arg8[%c0_6, %c0_7] : memref<16x96xf32, #tpu.memory_space<vmem>>, vector<16x96xf32>
    tpu.vector_store %arg8[%c0_6, %c0_7], %7 {strides = array<i32>} : memref<16x96xf32, #tpu.memory_space<vmem>>, vector<16x96xf32>,
    %c0_i32_8 = arith.constant 0 : i32
    %9 = arith.cmpi eq, %arg1, %c0_i32_8 : i32
    %10 = arith.extui %9 : i1 to i32
    %c0_i32_9 = arith.constant 0 : i32
    %11 = arith.cmpi ne, %10, %c0_i32_9 : i32
    scf.if %11 {
      %c0_10 = arith.constant 0 : index
      %c0_11 = arith.constant 0 : index
      %12 = vector.load %arg8[%c0_10, %c0_11] : memref<16x96xf32, #tpu.memory_space<vmem>>, vector<16x96xf32>
      %c0_12 = arith.constant 0 : index
      %c0_13 = arith.constant 0 : index
      %13 = vector.load %arg4[%c0_12, %c0_13] : memref<1x96xf32, #tpu.memory_space<vmem>>, vector<1x96xf32>
      %14 = vector.broadcast %13 : vector<1x96xf32> to vector<16x96xf32>
      %15 = arith.addf %12, %14 : vector<16x96xf32>
      %16 = vector.extract_strided_slice %15 {offsets = [0, 0], sizes = [16, 32], strides = [1, 1]} : vector<16x96xf32> to vector<16x32xf32>
      %17 = arith.truncf %16 : vector<16x32xf32> to vector<16x32xbf16>
      %c0_14 = arith.constant 0 : index
      %c0_15 = arith.constant 0 : index
      %18 = vector.load %arg5[%c0_14, %c0_15] : memref<16x32xbf16, #tpu.memory_space<vmem>>, vector<16x32xbf16>
      tpu.vector_store %arg5[%c0_14, %c0_15], %17 {strides = array<i32>} : memref<16x32xbf16, #tpu.memory_space<vmem>>, vector<16x32xbf16>,
      %19 = vector.extract_strided_slice %15 {offsets = [0, 32], sizes = [16, 32], strides = [1, 1]} : vector<16x96xf32> to vector<16x32xf32>
      %20 = arith.truncf %19 : vector<16x32xf32> to vector<16x32xbf16>
      %c0_16 = arith.constant 0 : index
      %c0_17 = arith.constant 0 : index
      %21 = vector.load %arg6[%c0_16, %c0_17] : memref<16x32xbf16, #tpu.memory_space<vmem>>, vector<16x32xbf16>
      tpu.vector_store %arg6[%c0_16, %c0_17], %20 {strides = array<i32>} : memref<16x32xbf16, #tpu.memory_space<vmem>>, vector<16x32xbf16>,
      %22 = vector.extract_strided_slice %15 {offsets = [0, 64], sizes = [16, 32], strides = [1, 1]} : vector<16x96xf32> to vector<16x32xf32>
      %23 = arith.truncf %22 : vector<16x32xf32> to vector<16x32xbf16>
      %c0_18 = arith.constant 0 : index
      %c0_19 = arith.constant 0 : index
      %24 = vector.load %arg7[%c0_18, %c0_19] : memref<16x32xbf16, #tpu.memory_space<vmem>>, vector<16x32xbf16>
      tpu.vector_store %arg7[%c0_18, %c0_19], %23 {strides = array<i32>} : memref<16x32xbf16, #tpu.memory_space<vmem>>, vector<16x32xbf16>,
    } else {
    }
    return
  }
  func.func @transform_0(%arg0: i32, %arg1: i32) -> (i32, i32) {
    %c0_i32 = arith.constant 0 : i32
    return %arg0, %arg1 : i32, i32
  }
  func.func @transform_1(%arg0: i32, %arg1: i32) -> (i32, i32) {
    %c0_i32 = arith.constant 0 : i32
    %c0_i32_0 = arith.constant 0 : i32
    return %arg1, %c0_i32 : i32, i32
  }
  func.func @transform_2(%arg0: i32, %arg1: i32) -> (i32, i32) {
    %c0_i32 = arith.constant 0 : i32
    %c0_i32_0 = arith.constant 0 : i32
    %c0_i32_1 = arith.constant 0 : i32
    return %c0_i32, %c0_i32_0 : i32, i32
  }
  func.func @transform_3(%arg0: i32, %arg1: i32) -> (i32, i32) {
    %c0_i32 = arith.constant 0 : i32
    %c0_i32_0 = arith.constant 0 : i32
    return %arg0, %c0_i32 : i32, i32
  }
  func.func @transform_4(%arg0: i32, %arg1: i32) -> (i32, i32) {
    %c0_i32 = arith.constant 0 : i32
    %c0_i32_0 = arith.constant 0 : i32
    return %arg0, %c0_i32 : i32, i32
  }
  func.func @transform_5(%arg0: i32, %arg1: i32) -> (i32, i32) {
    %c0_i32 = arith.constant 0 : i32
    %c0_i32_0 = arith.constant 0 : i32
    return %arg0, %c0_i32 : i32, i32
  }
}

</mosaic_0001>

<bundles_post_ra>
// kernel: tpu_custom_call.1
= control target key start
LH: loop header
LB: loop body
LE: loop exit
PB: predicated region body
PF: predicated region fallthrough
CT: control target
= control target key end

     0   :  { %11 = vsyncpa [#allocation4], 0  ;;  %s508_s0 = inlined_call_operand.hbm [shape: bf16[16,32], index: 0, kind: input, shape index: {}]   ;;  %s509_s1 = inlined_call_operand.hbm [shape: bf16[32,96], index: 1, kind: input, shape index: {}]   ;;  %s510_s2 = inlined_call_operand.vmem [shape: f32[1,96], index: 2, kind: input, shape index: {}]   ;;  %s511_s3 = inlined_call_operand.hbm [shape: bf16[16,32], index: 3, kind: output, shape index: {0}]   ;;  %s512_s4 = inlined_call_operand.hbm [shape: bf16[16,32], index: 4, kind: output, shape index: {1}]   ;;  %s513_s5 = inlined_call_operand.hbm [shape: bf16[16,32], index: 5, kind: output, shape index: {2}]  }
   0x1   :  { %12 = vsyncpa [#allocation7], 0 }
   0x2   :  { %13 = vsyncpa [#allocation5], 0 }
   0x3   :  { %14 = vsyncpa [#allocation10], 0  ;;  %s371_s18 = smov [#allocation3]   ;;  %s253_s22 = scalar_lea.hbm %s508_s0, 128 }
   0x4   :  { %s20_s19 = sshll.u32 %s371_s18, 4  ;;  %p254_p0 = scmp.ne.s32.totalorder %s508_s0, %s253_s22  ;;  %s21_s19 = int_to_ptr.vmem [resolvable:$true] %s20_s19 }
   0x5   :  { %p257_p1 = scmp.lt.u32.totalorder %s253_s22, %s508_s0 }
   0x7   :  { %p259_p2 = pnand %p257_p1, %p254_p0 }
   0x9   :  { %262 = shalt.err (!%p259_p2)
}
   0xa   :  { %s263_s27 = scalar_lea.vmem %s21_s19, 128  ;;  %p268_p4 = scmp.lt.s32.totalorder %s21_s19, %s21_s19 }
   0xb   :  { %p264_p3 = scmp.ne.s32.totalorder %s21_s19, %s263_s27  ;;  %p269_p5 = scmp.lt.s32.totalorder %s263_s27, %s263_s27 }
   0xd   :  { %p270_p6 = por %p269_p5, %p268_p4 }
   0xf   :  { %p271_p7 = pnand %p270_p6, %p264_p3 }
  0x11   :  { %274 = shalt.err (!%p271_p7)
}
  0x12   :  { %s372_s28 = smov 64   ;;  %s373_s29 = smov 4  }
  0x13   :  { %26 = dma.hbm_to_vmem [thread:$0]  %s508_s0, 128, %s21_s19, [#allocation4], %s372_s28, %s372_s28, %s373_s29  }
  0x14   :  { %s374_s7 = smov [#allocation6]   ;;  %s275_s11 = scalar_lea.hbm %s509_s1, 256 }
  0x15   :  { %s32_s8 = sshll.u32 %s374_s7, 4  ;;  %p276_p8 = scmp.ne.s32.totalorder %s509_s1, %s275_s11  ;;  %s33_s8 = int_to_ptr.vmem [resolvable:$true] %s32_s8 }
  0x16   :  { %p279_p9 = scmp.lt.u32.totalorder %s275_s11, %s509_s1 }
  0x18   :  { %p281_p10 = pnand %p279_p9, %p276_p8 }
  0x1a   :  { %284 = shalt.err (!%p281_p10)
}
  0x1b   :  { %s285_s16 = scalar_lea.vmem %s33_s8, 256  ;;  %p290_p12 = scmp.lt.s32.totalorder %s33_s8, %s33_s8 }
  0x1c   :  { %p286_p11 = scmp.ne.s32.totalorder %s33_s8, %s285_s16  ;;  %p291_p13 = scmp.lt.s32.totalorder %s285_s16, %s285_s16 }
  0x1e   :  { %p292_p0 = por %p291_p13, %p290_p12 }
  0x20   :  { %p293_p1 = pnand %p292_p0, %p286_p11 }
  0x22   :  { %296 = shalt.err (!%p293_p1)
}
  0x23   :  { %38 = dma.hbm_to_vmem [thread:$0]  %s509_s1, 256, %s33_s8, [#allocation7], %s372_s28, %s372_s28, %s373_s29  }
  0x24   :  { %363 = dma.done.wait [#allocation4], 128  }
  0x25   :  { %364 = vsyncadd [#allocation4], 4294967168 }
  0x26   :  { %365 = dma.done.wait [#allocation7], 256  }
  0x27   :  { %366 = vsyncadd [#allocation7], 4294967040  ;;  %vm52_vm0 = vcmask 785408   ;;  %v375_v0 = vmov 0.0   ;;  %vm376_vm1 = vmmov 0   ;;  %v250_v1 = vld [vmem:[#allocation6] sm:$0xff]  }
  0x28   :  { %53 = vst.msk [vmem:[#allocation2] sm:$0xff] %vm52_vm0, %v375_v0  ;;  %54 = vst.msk [vmem:[#allocation2 + $0x8] sm:$0xff] %vm52_vm0, %v375_v0  ;;  %232 = vmatprep.subr.bf16.mxu0 %v375_v0  ;;  %236 = vmatprep.mubr.msk.bf16.mxu0 %vm376_vm1, %v375_v0  ;;  %v251_v2 = vld [vmem:[#allocation6 + $0x8] sm:$0xff]   ;;  %v252_v3 = vld [vmem:[#allocation3] sm:$0xff]   ;;  %vm80_vm2 = vcmask 261120   ;;  %vm152_vm3 = vcmask 257024  }
  0x29   :  { %233 = vmatpush3.bf16.msra.mxu0 %v250_v1  ;;  %v224_v12 = vld [vmem:[%s510_s2] ss:$0 sm:$0xff]  ;;  %s377_s19 = smov [#allocation8]   ;;  %s378_s21 = smov 96  }
  0x2a   :  { %234 = vmatprep.subr.bf16.mxu0 %v375_v0  ;;  %s176_s20 = sshll.u32 %s377_s19, 4  ;;  %s177_s20 = int_to_ptr.vmem [resolvable:$true] %s176_s20 }
  0x2b   :  { %s297_s22 = scalar_lea.vmem %s177_s20, 128  ;;  %p302_p3 = scmp.lt.s32.totalorder %s177_s20, %s177_s20 }
  0x2c   :  { %p298_p2 = scmp.ne.s32.totalorder %s177_s20, %s297_s22  ;;  %p303_p4 = scmp.lt.s32.totalorder %s297_s22, %s297_s22 }
  0x2d   :  { %235 = vmatpush3.bf16.msra.mxu0 %v251_v2 }
  0x2e   :  { %p304_p5 = por %p303_p4, %p302_p3 }
  0x2f   :  { %v55_v4 = vld [vmem:[#allocation2] sm:$0xff]  ;;  %v56_v6 = vld [vmem:[#allocation2 + $0x8] sm:$0xff] }
  0x30   :  { %237 = vmatmul.mubr.msk.bf16.vlgmr.msra.gmra.mrb[0].mxu0 %vm80_vm2, %v252_v3  ;;  %p305_p6 = pnand %p304_p5, %p298_p2 }
 0x103   :  { %v118_v5 = vpop.f32.mrb[0].mxu0 }
 0x104   :  { %v125_v7 = vadd.f32 %v118_v5, %v55_v4  ;;  %v238_v8 = vpop.f32.mrb[1].mxu0 }
 0x105   :  { %v121_v9 = vpop.f32.mrb[2].mxu0 }
 0x106   :  { %128 = vst.msk [vmem:[#allocation2] sm:$0xff] %vm52_vm0, %v125_v7  ;;  %v126_v10 = vadd.f32 %v121_v9, %v56_v6  ;;  %v239_v11 = vpop.f32.mrb[3].mxu0 }
 0x108   :  { %129 = vst.msk [vmem:[#allocation2 + $0x8] sm:$0xff] %vm52_vm0, %v126_v10 }
 0x10d   :  { %v133_v13 = vld [vmem:[#allocation2] sm:$0xff] }
 0x10e   :  { %v142_v14 = vadd.f32 %v224_v12, %v133_v13 }
 0x10f   :  { %v134_v15 = vld [vmem:[#allocation2 + $0x8] sm:$0xff] }
 0x110   :  { %v227_v16 = vpack.c.bf16 %v142_v14, %v142_v14  ;;  %v143_v17 = vadd.f32 %v224_v12, %v134_v15 }
 0x112   :  { %163 = vrot.lane.b32.xlu1 %v227_v16, %s372_s28  ;;  %155 = vrot.lane.b32.xlu0 %v227_v16, %s378_s21  ;;  %v228_v18 = vpack.c.bf16 %v143_v17, %v143_v17  ;;  %153 = vst.msk [vmem:[#allocation8] sm:$0xf] %vm152_vm3, %v227_v16 }
 0x114   :  { %154 = vst.msk [vmem:[#allocation8 + $0x4] sm:$0xf] %vm152_vm3, %v228_v18 }
 0x115   :  { %308 = shalt.err (!%p305_p6)
}
 0x116   :  { %s309_s24 = scalar_lea.hbm %s511_s3, 128 }
 0x117   :  { %p310_p7 = scmp.ne.s32.totalorder %s511_s3, %s309_s24  ;;  %p313_p8 = scmp.lt.u32.totalorder %s309_s24, %s511_s3 }
 0x119   :  { %p315_p9 = pnand %p313_p8, %p310_p7 }
 0x11b   :  { %318 = shalt.err (!%p315_p9)
}
 0x11c   :  { %182 = dma.vmem_to_hbm [thread:$0]  %s177_s20, 128, %s511_s3, [#allocation5], %s372_s28, %s372_s28, %s373_s29  }
 0x11d   :  { %165 = vrot.lane.b32.xlu1 %v228_v18, %s372_s28  ;;  %157 = vrot.lane.b32.xlu0 %v228_v18, %s378_s21  ;;  %s379_s8 = smov [#allocation9]   ;;  %s380_s10 = smov [#allocation11]  }
 0x11e   :  { %s188_s9 = sshll.u32 %s379_s8, 4  ;;  %s200_s11 = sshll.u32 %s380_s10, 4  ;;  %s189_s9 = int_to_ptr.vmem [resolvable:$true] %s188_s9  ;;  %s469_s11 = int_to_ptr.vmem [resolvable:$true] %s200_s11 }
 0x11f   :  { %s319_s3 = scalar_lea.vmem %s189_s9, 128  ;;  %p324_p11 = scmp.lt.s32.totalorder %s189_s9, %s189_s9 }
 0x120   :  { %p320_p10 = scmp.ne.s32.totalorder %s189_s9, %s319_s3  ;;  %p325_p12 = scmp.lt.s32.totalorder %s319_s3, %s319_s3 }
 0x122   :  { %p326_p13 = por %p325_p12, %p324_p11 }
 0x124   :  { %p327_p0 = pnand %p326_p13, %p320_p10 }
 0x184   :  { %v164_v19 = vpop.permute.xlu1 %163  ;;  %v156_v20 = vpop.permute.xlu0 %155 }
 0x185   :  { %169 = vst.msk [vmem:[#allocation11] sm:$0xf] %vm152_vm3, %v164_v19  ;;  %161 = vst.msk [vmem:[#allocation9] sm:$0xf] %vm152_vm3, %v156_v20 }
 0x18f   :  { %v166_v21 = vpop.permute.xlu1 %165  ;;  %v158_v22 = vpop.permute.xlu0 %157 }
 0x190   :  { %170 = vst.msk [vmem:[#allocation11 + $0x4] sm:$0xf] %vm152_vm3, %v166_v21  ;;  %162 = vst.msk [vmem:[#allocation9 + $0x4] sm:$0xf] %vm152_vm3, %v158_v22 }
 0x191   :  { %330 = shalt.err (!%p327_p0)
}
 0x192   :  { %s331_s14 = scalar_lea.hbm %s512_s4, 128 }
 0x193   :  { %p332_p1 = scmp.ne.s32.totalorder %s512_s4, %s331_s14  ;;  %p335_p2 = scmp.lt.u32.totalorder %s331_s14, %s512_s4 }
 0x195   :  { %p337_p3 = pnand %p335_p2, %p332_p1 }
 0x197   :  { %340 = shalt.err (!%p337_p3)
}
 0x198   :  { %194 = dma.vmem_to_hbm [thread:$0]  %s189_s9, 128, %s512_s4, [#allocation10], %s372_s28, %s372_s28, %s373_s29  }
 0x199   :  { %s341_s19 = scalar_lea.vmem %s469_s11, 128  ;;  %p346_p5 = scmp.lt.s32.totalorder %s469_s11, %s469_s11 }
 0x19a   :  { %p342_p4 = scmp.ne.s32.totalorder %s469_s11, %s341_s19  ;;  %p347_p6 = scmp.lt.s32.totalorder %s341_s19, %s341_s19 }
 0x19c   :  { %p348_p7 = por %p347_p6, %p346_p5 }
 0x19e   :  { %p349_p8 = pnand %p348_p7, %p342_p4 }
 0x1a0   :  { %352 = shalt.err (!%p349_p8)
}
 0x1a1   :  { %s353_s22 = scalar_lea.hbm %s513_s5, 128 }
 0x1a2   :  { %p354_p9 = scmp.ne.s32.totalorder %s513_s5, %s353_s22  ;;  %p357_p10 = scmp.lt.u32.totalorder %s353_s22, %s513_s5 }
 0x1a4   :  { %p359_p11 = pnand %p357_p10, %p354_p9 }
 0x1a6   :  { %362 = shalt.err (!%p359_p11)
}
 0x1a7   :  { %206 = dma.vmem_to_hbm [thread:$0]  %s469_s11, 128, %s513_s5, [#allocation10], %s372_s28, %s372_s28, %s373_s29  }
 0x1a8   :  { %367 = dma.done.wait [#allocation5], 128  }
 0x1a9   :  { %368 = vsyncadd [#allocation5], 4294967168 }
 0x1aa   :  { %369 = dma.done.wait [#allocation10], 256  }
 0x1ab   :  { %370 = vsyncadd [#allocation10], 4294967040 }
 0x1ac   :  { %216 = vsyncpa [#allocation4], 1 }
 0x1ad   :  { %217 = vsyncpa [#allocation7], 1 }
 0x1ae   :  { %218 = vsyncpa [#allocation5], 1 }
 0x1af   :  { %219 = vsyncpa [#allocation10], 1 }

</bundles_post_ra>
